<compile_context>
chip_gen: v5e
topology: v5e:2x2
jax: 0.10.0
libtpu: 0.0.40
codegen_flags: <defaults>
</compile_context>

<pallas_src>
import jax
import jax.numpy as jnp
from jax import lax
from jax.experimental import pallas as pl
from jax.experimental.pallas import tpu as pltpu

VMEM_SPEC = pl.BlockSpec(memory_space=pltpu.MemorySpace.VMEM)
_VMEM_LIMIT = 32 * 1024 * 1024   # ample for every kernel here; <= half of v7x per-TC VMEM
_UNROLL_T = 16                   # fully unroll the recurrence for short sequences
_ROW_ALIGN = 16                  # bf16 sublane packing (2 rows / sublane)


def _round_up(x, m):
    return ((x + m - 1) // m) * m


# ----------------------------------------------------------------------------
# Kernel 1: tiled dense linear layer  o = x @ W^T + b
#   grid = (row_blocks, k_blocks); rows "parallel" (megacore friendly), K reduction
#   "arbitrary" through a f32 VMEM accumulator.  x and W stream in as bf16.
# ----------------------------------------------------------------------------
def _linear_kernel(x_ref, wt_ref, b_ref, o_ref, acc_ref):
    @pl.when(pl.program_id(1) == 0)
    def _():
        acc_ref[...] = jnp.zeros_like(acc_ref)

    acc_ref[...] += jnp.dot(x_ref[...], wt_ref[...],
                            preferred_element_type=jnp.float32)

    @pl.when(pl.program_id(1) == pl.num_programs(1) - 1)
    def _():
        o_ref[...] = (acc_ref[...] + b_ref[...]).astype(o_ref.dtype)


def pack_linear(w, b, *, block_k=512):
    """One-time pack: w (F, K), b (F,) -> transposed bf16 K-padded weight + f32 bias."""
    f, k = int(w.shape[0]), int(w.shape[1])
    tk = block_k if k >= block_k else _round_up(k, 128)
    k_pad = _round_up(k, tk)
    wt = jnp.zeros((k_pad, f), jnp.bfloat16).at[:k, :].set(w.T.astype(jnp.bfloat16))
    b2 = b.reshape(1, f).astype(jnp.float32)
    return {"wt": wt, "b": b2, "k": k, "tk": tk}


def pallas_linear(x, packed, *, out_dtype=jnp.float32, block_rows=256):
    # x: (N, K) -> (N, F) in out_dtype (bf16 matmul inputs, f32 accumulation).
    n, k = x.shape
    wt, b2, tk = packed["wt"], packed["b"], packed["tk"]
    k_pad, f = int(wt.shape[0]), int(wt.shape[1])

    tr = min(block_rows, _round_up(n, _ROW_ALIGN))
    if n >= 2 * _ROW_ALIGN:                       # aim for >=2 row blocks (v7x megacore)
        tr = min(tr, _round_up((n + 1) // 2, _ROW_ALIGN))
    n_pad = _round_up(n, tr)

    x_b = x.astype(jnp.bfloat16)                  # stream activations as bf16
    if (n_pad, k_pad) != (n, k):
        x_b = jnp.pad(x_b, ((0, n_pad - n), (0, k_pad - k)))

    grid = (n_pad // tr, k_pad // tk)
    out = pl.pallas_call(
        _linear_kernel,
        out_shape=jax.ShapeDtypeStruct((n_pad, f), out_dtype),
        grid_spec=pltpu.PrefetchScalarGridSpec(
            num_scalar_prefetch=0,
            grid=grid,
            in_specs=[
                pl.BlockSpec((tr, tk), lambda i, kk: (i, kk)),
                pl.BlockSpec((tk, f), lambda i, kk: (kk, 0)),
                pl.BlockSpec((1, f), lambda i, kk: (0, 0)),
            ],
            out_specs=pl.BlockSpec((tr, f), lambda i, kk: (i, 0)),
            scratch_shapes=[pltpu.VMEM((tr, f), jnp.float32)],
        ),
        compiler_params=pltpu.CompilerParams(
            dimension_semantics=("parallel", "arbitrary"),
            vmem_limit_bytes=_VMEM_LIMIT),
    )(x_b, wt, b2)
    return out[:n] if n_pad != n else out


# ----------------------------------------------------------------------------
# Kernel 2: bidirectional GRU recurrence for one layer (both directions fused).
#   gi = x @ Wih^T + b_ih (both directions, all timesteps) is hoisted out and streamed
#   in as bf16; only the hidden matmul remains in the loop and both directions share a
#   SINGLE MXU issue per step.  PyTorch gate convention (r, z, n).
#
#   gi_ref:  (T, Bb, 6H) bf16   cols [0:3H]=forward gates, [3H:6H]=backward gates
#   whh_ref: (H, 6H)     bf16   [whh_fw.T | whh_bw.T]
#   bhh_ref: (2, 3H)     f32    row0 = bias_hh_fw, row1 = bias_hh_bw
#   out_ref: (T, Bb, 2H) f32    cols [0:H]=forward h_t, [H:2H]=backward h_t
#   Grid: batch blocks ("parallel") -> bounds VMEM and shards across v7x's two TCs.
# ----------------------------------------------------------------------------
def _bigru_rec_kernel(gi_ref, whh_ref, bhh_ref, out_ref):
    t_len, bb, six_h = gi_ref.shape
    hid = six_h // 6
    g = 3 * hid

    bhh_f = bhh_ref[0:1, :]
    bhh_b = bhh_ref[1:2, :]

    def gates(gi, gh, h_prev):
        r = jax.nn.sigmoid(gi[:, 0:hid] + gh[:, 0:hid])
        z = jax.nn.sigmoid(gi[:, hid:2 * hid] + gh[:, hid:2 * hid])
        n = jnp.tanh(gi[:, 2 * hid:3 * hid] + r * gh[:, 2 * hid:3 * hid])
        return (1.0 - z) * n + z * h_prev

    def step(t, carry):
        h_f, h_b = carry
        t_rev = t_len - 1 - t
        gi_f = gi_ref[t, :, 0:g].astype(jnp.float32)          # lane-aligned slices
        gi_b = gi_ref[t_rev, :, g:2 * g].astype(jnp.float32)  # backward: reversed time
        # One MXU issue per step for BOTH directions; the weight panel is sourced from
        # its VMEM ref here (not pinned in vregs across the unrolled loop).
        h_cat = jnp.concatenate([h_f, h_b], axis=0).astype(jnp.bfloat16)     # (2*Bb, H)
        gh_all = jnp.dot(h_cat, whh_ref[...], preferred_element_type=jnp.float32)
        gh_f = gh_all[0:bb, 0:g] + bhh_f
        gh_b = gh_all[bb:2 * bb, g:2 * g] + bhh_b
        h_f = gates(gi_f, gh_f, h_f)
        h_b = gates(gi_b, gh_b, h_b)
        out_ref[t, :, 0:hid] = h_f
        out_ref[t_rev, :, hid:2 * hid] = h_b
        return (h_f, h_b)

    h0 = jnp.zeros((bb, hid), dtype=jnp.float32)
    if t_len <= _UNROLL_T:
        carry = (h0, h0)
        for t in range(t_len):          # static unroll: constant indices, LLO overlap
            carry = step(t, carry)
    else:
        # Partial unroll: keeps LLO scheduling overlap while bounding live ranges.
        lax.fori_loop(0, t_len, step, (h0, h0), unroll=2)


def pallas_bigru_recurrence(gi_tbg, whh_cat, bhh):
    t_len, batch, six_h = gi_tbg.shape
    hid = six_h // 6
    # Batch block: full batch when small; 16-row blocks (bf16 sublane aligned) otherwise.
    bb = batch if (batch < 16 or batch % 16 != 0) else 16
    grid = (batch // bb,)
    return pl.pallas_call(
        _bigru_rec_kernel,
        out_shape=jax.ShapeDtypeStruct((t_len, batch, 2 * hid), jnp.float32),
        grid_spec=pltpu.PrefetchScalarGridSpec(
            num_scalar_prefetch=0,
            grid=grid,
            in_specs=[
                pl.BlockSpec((t_len, bb, six_h), lambda i: (0, i, 0)),
                pl.BlockSpec((hid, six_h), lambda i: (0, 0)),
                pl.BlockSpec((2, 3 * hid), lambda i: (0, 0)),
            ],
            out_specs=pl.BlockSpec((t_len, bb, 2 * hid), lambda i: (0, i, 0)),
        ),
        compiler_params=pltpu.CompilerParams(
            dimension_semantics=("parallel",),
            vmem_limit_bytes=_VMEM_LIMIT),
    )(gi_tbg, whh_cat, bhh)


# ----------------------------------------------------------------------------
# Kernel 3: fused temporal mean-pool (video time-major + audio) + split classifier.
#   cls(cat(mv, ma)) = mv @ Wv^T + ma @ Wa^T + b ; class dim pre-padded to 128 lanes.
# ----------------------------------------------------------------------------
def _fuse_cls_kernel(hv_ref, ha_ref, wv_ref, wa_ref, b_ref, o_ref):
    mv = jnp.mean(hv_ref[...], axis=0)   # h_v is time-major (T, B, 2H) -> (B, 2H)
    ma = jnp.mean(ha_ref[...], axis=1)   # h_a is (B, Ta, 2H)           -> (B, 2H)
    o_ref[...] = (
        jnp.dot(mv.astype(jnp.bfloat16), wv_ref[...], preferred_element_type=jnp.float32)
        + jnp.dot(ma.astype(jnp.bfloat16), wa_ref[...], preferred_element_type=jnp.float32)
        + b_ref[...]
    )


def pallas_fuse_cls(h_v_tbd, h_a_btd, cls_pack):
    batch = h_v_tbd.shape[1]
    c_pad = int(cls_pack["wv"].shape[1])
    out = pl.pallas_call(
        _fuse_cls_kernel,
        out_shape=jax.ShapeDtypeStruct((batch, c_pad), jnp.float32),
        in_specs=[VMEM_SPEC] * 5,
        out_specs=VMEM_SPEC,
        compiler_params=pltpu.CompilerParams(vmem_limit_bytes=_VMEM_LIMIT),
    )(h_v_tbd, h_a_btd, cls_pack["wv"], cls_pack["wa"], cls_pack["b"])
    return out[:, :cls_pack["n_class"]]


# ----------------------------------------------------------------------------
# Parameter init (deterministic, synthetic), one-time kernel-layout packing, forward
# ----------------------------------------------------------------------------
def init_params(key, *, frame_pixels, audio_dim, feat, hidden, n_class):
    ks = list(jax.random.split(key, 24))

    def nrm(k, shape, fan_in):
        return jax.random.normal(k, shape, jnp.float32) / jnp.sqrt(jnp.float32(fan_in))

    p = {
        "video_w": nrm(ks[0], (feat, frame_pixels), frame_pixels),
        "video_b": nrm(ks[1], (feat,), feat),
        "audio_w": nrm(ks[2], (2 * hidden, audio_dim), audio_dim),
        "audio_b": nrm(ks[3], (2 * hidden,), hidden),
        "cls_w": nrm(ks[4], (n_class, 2 * hidden * 2), 2 * hidden * 2),
        "cls_b": nrm(ks[5], (n_class,), n_class),
    }
    gru = []
    ki = 6
    in_dims = [feat, 2 * hidden]   # layer 0 input, layer 1 input (bidirectional concat)
    for d_in in in_dims:
        layer = {}
        for dname in ("fw", "bw"):
            w_ih = nrm(ks[ki], (3 * hidden, d_in), d_in); ki += 1
            w_hh = nrm(ks[ki], (3 * hidden, hidden), hidden); ki += 1
            b_ih = nrm(ks[ki], (3 * hidden,), hidden); ki += 1
            b_hh = nrm(ks[ki], (3 * hidden,), hidden); ki += 1
            layer[dname] = (w_ih, w_hh, b_ih, b_hh)
        gru.append(layer)
    p["gru"] = gru
    return p


def pack_params(p):
    """One-time conversion of PyTorch-style params to kernel-ready layouts."""
    packed = {
        "video": pack_linear(p["video_w"], p["video_b"]),
        "audio": pack_linear(p["audio_w"], p["audio_b"]),
        "gru": [],
    }
    for lyr in p["gru"]:
        w_ih_f, w_hh_f, b_ih_f, b_hh_f = lyr["fw"]
        w_ih_b, w_hh_b, b_ih_b, b_hh_b = lyr["bw"]
        w_ih_cat = jnp.concatenate([w_ih_f, w_ih_b], axis=0)          # (6H, Din)
        b_ih_cat = jnp.concatenate([b_ih_f, b_ih_b], axis=0)          # (6H,)
        whh_cat = jnp.concatenate(
            [w_hh_f.T, w_hh_b.T], axis=1).astype(jnp.bfloat16)        # (H, 6H)
        bhh = jnp.stack([b_hh_f, b_hh_b], axis=0).astype(jnp.float32)  # (2, 3H)
        packed["gru"].append(
            {"ih": pack_linear(w_ih_cat, b_ih_cat), "whh": whh_cat, "bhh": bhh})

    w_cls, b_cls = p["cls_w"], p["cls_b"]
    n_class = int(w_cls.shape[0])
    two_h = int(w_cls.shape[1]) // 2
    c_pad = _round_up(max(n_class, 1), 128)
    wv = jnp.zeros((two_h, c_pad), jnp.bfloat16).at[:, :n_class].set(
        w_cls[:, :two_h].T.astype(jnp.bfloat16))
    wa = jnp.zeros((two_h, c_pad), jnp.bfloat16).at[:, :n_class].set(
        w_cls[:, two_h:].T.astype(jnp.bfloat16))
    bb = jnp.zeros((1, c_pad), jnp.float32).at[:, :n_class].set(
        b_cls.reshape(1, -1).astype(jnp.float32))
    packed["cls"] = {"wv": wv, "wa": wa, "b": bb, "n_class": n_class}
    return jax.tree_util.tree_map(jax.device_put, packed)


def avsr_forward(packed, v, a):
    # v: (B, T, C, H, W), a: (B, Ta, F)
    b, t = v.shape[0], v.shape[1]
    # Single small transpose of the flattened frames so everything downstream (encoder
    # output, GRU layers, mean pool) is consumed time-major with no per-layer transposes.
    pix_tm = jnp.transpose(v.reshape(b, t, -1), (1, 0, 2)).reshape(t * b, -1)
    f_v = pallas_linear(pix_tm, packed["video"]).reshape(t, b, -1)     # (T, B, feat)
    # eval mode -> dropout is identity
    h = f_v
    for lyr in packed["gru"]:
        # Hoisted input projection, both directions, all timesteps: one matmul, bf16 out.
        gi = pallas_linear(h.reshape(t * b, -1), lyr["ih"],
                           out_dtype=jnp.bfloat16).reshape(t, b, -1)   # (T, B, 6H) bf16
        h = pallas_bigru_recurrence(gi, lyr["whh"], lyr["bhh"])        # (T, B, 2H) f32
    h_v = h

    ba, ta = a.shape[0], a.shape[1]
    h_a = pallas_linear(a.reshape(ba * ta, -1), packed["audio"]).reshape(ba, ta, -1)

    return pallas_fuse_cls(h_v, h_a, packed["cls"])                    # (B, n_class)


# ----------------------------------------------------------------------------
# Pure-JAX reference with the same numerics (bf16 matmul inputs + bf16 gi storage,
# f32 accumulation and gate math)
# ----------------------------------------------------------------------------
def _ref_linear(x, w, b):
    return jnp.dot(x.astype(jnp.bfloat16), w.T.astype(jnp.bfloat16),
                   preferred_element_type=jnp.float32) + b.astype(jnp.float32)


def _ref_gru_dir(x_tbd, w_ih, w_hh, b_ih, b_hh, reverse=False):
    t_len, batch, _ = x_tbd.shape
    hid = w_hh.shape[1]
    xs = jnp.flip(x_tbd, axis=0) if reverse else x_tbd
    gi_all = jnp.dot(xs.reshape(t_len * batch, -1).astype(jnp.bfloat16),
                     w_ih.T.astype(jnp.bfloat16),
                     preferred_element_type=jnp.float32).reshape(t_len, batch, 3 * hid)
    gi_all = (gi_all + b_ih).astype(jnp.bfloat16).astype(jnp.float32)  # mirror bf16 gi
    whh_t = w_hh.T.astype(jnp.bfloat16)

    def step(h, gi_t):
        gh = jnp.dot(h.astype(jnp.bfloat16), whh_t,
                     preferred_element_type=jnp.float32) + b_hh
        r = jax.nn.sigmoid(gi_t[:, :hid] + gh[:, :hid])
        z = jax.nn.sigmoid(gi_t[:, hid:2 * hid] + gh[:, hid:2 * hid])
        n = jnp.tanh(gi_t[:, 2 * hid:] + r * gh[:, 2 * hid:])
        h_new = (1.0 - z) * n + z * h
        return h_new, h_new

    _, hs = lax.scan(step, jnp.zeros((batch, hid), jnp.float32), gi_all)
    return jnp.flip(hs, axis=0) if reverse else hs        # (T, B, H)


def ref_forward(params, v, a):
    b, t = v.shape[0], v.shape[1]
    pix_tm = jnp.transpose(v.reshape(b, t, -1), (1, 0, 2)).reshape(t * b, -1)
    h = _ref_linear(pix_tm, params["video_w"], params["video_b"]).reshape(t, b, -1)
    for lyr in params["gru"]:
        fw = _ref_gru_dir(h, *lyr["fw"], reverse=False)
        bw = _ref_gru_dir(h, *lyr["bw"], reverse=True)
        h = jnp.concatenate([fw, bw], axis=-1)             # (T, B, 2H)
    h_v = h
    ba, ta = a.shape[0], a.shape[1]
    h_a = _ref_linear(a.reshape(ba * ta, -1),
                      params["audio_w"], params["audio_b"]).reshape(ba, ta, -1)
    hcat = jnp.concatenate([jnp.mean(h_v, axis=0), jnp.mean(h_a, axis=1)], axis=-1)
    return _ref_linear(hcat, params["cls_w"], params["cls_b"])


if __name__ == "__main__":
    # Small, module-consistent shapes (512 -> 128 hidden so gates are lane-aligned,
    # 500-class -> 10-class).
    B, T, C, H, W = 2, 8, 1, 16, 16     # video -> frame_pixels = 256
    TA, FA = 12, 80                     # audio (exercises K padding to 128)
    FEAT, HID, NCLS = 256, 128, 10

    key = jax.random.PRNGKey(0)
    kv, ka, kp = jax.random.split(key, 3)
    v = jax.random.normal(kv, (B, T, C, H, W), jnp.float32)
    a = jax.random.normal(ka, (B, TA, FA), jnp.float32)
    params = init_params(kp, frame_pixels=C * H * W, audio_dim=FA,
                         feat=FEAT, hidden=HID, n_class=NCLS)
    packed = pack_params(params)        # one-time kernel-layout packing (not per-forward)

    y = jax.block_until_ready(avsr_forward(packed, v, a))
    y_ref = jax.block_until_ready(ref_forward(params, v, a))

    assert y.shape == (B, NCLS)
    assert jnp.allclose(y, y_ref, atol=2e-2, rtol=2e-2), "Pallas output mismatch vs JAX reference"

    print("KERNEL_OK")
</pallas_src>

<mosaic_0001>
module attributes {stable_mosaic.version = 11 : i64} {
  func.func @_linear_kernel(%arg0: i32, %arg1: i32, %arg2: memref<16x256xbf16, #tpu.memory_space<vmem>>, %arg3: memref<256x256xbf16, #tpu.memory_space<vmem>>, %arg4: memref<1x256xf32, #tpu.memory_space<vmem>>, %arg5: memref<16x256xf32, #tpu.memory_space<vmem>>, %arg6: memref<16x256xf32, #tpu.memory_space<vmem>>) attributes {dimension_semantics = [#tpu.dimension_semantics<parallel>, #tpu.dimension_semantics<arbitrary>], iteration_bounds = array<i64: 1, -9223372036854775808>, scalar_prefetch = 0 : i64, scratch_operands = 1 : i64, tpu.core_type = #tpu.core_type<tc>, window_params = [{transform_indices = @transform_0, window_bounds = array<i64: 16, 256>}, {transform_indices = @transform_1, window_bounds = array<i64: 256, 256>}, {pipeline_mode = #tpu.pipeline_mode<synchronous>, transform_indices = @transform_2, window_bounds = array<i64: 1, 256>}, {transform_indices = @transform_3, window_bounds = array<i64: 16, 256>}]} {
    %c0_i32 = arith.constant 0 : i32
    %0 = arith.cmpi eq, %arg1, %c0_i32 : i32
    %1 = arith.extui %0 : i1 to i32
    %c0_i32_0 = arith.constant 0 : i32
    %2 = arith.cmpi ne, %1, %c0_i32_0 : i32
    scf.if %2 {
      %cst_9 = arith.constant 0.000000e+00 : f32
      %14 = vector.broadcast %cst_9 : f32 to vector<16x256xf32>
      %c0_10 = arith.constant 0 : index
      %c0_11 = arith.constant 0 : index
      %15 = vector.load %arg6[%c0_10, %c0_11] : memref<16x256xf32, #tpu.memory_space<vmem>>, vector<16x256xf32>
      tpu.vector_store %arg6[%c0_10, %c0_11], %14 {strides = array<i32>} : memref<16x256xf32, #tpu.memory_space<vmem>>, vector<16x256xf32>,
    } else {
    }
    %c0 = arith.constant 0 : index
    %c0_1 = arith.constant 0 : index
    %3 = vector.load %arg6[%c0, %c0_1] : memref<16x256xf32, #tpu.memory_space<vmem>>, vector<16x256xf32>
    %c0_2 = arith.constant 0 : index
    %c0_3 = arith.constant 0 : index
    %4 = vector.load %arg2[%c0_2, %c0_3] : memref<16x256xbf16, #tpu.memory_space<vmem>>, vector<16x256xbf16>
    %c0_4 = arith.constant 0 : index
    %c0_5 = arith.constant 0 : index
    %5 = vector.load %arg3[%c0_4, %c0_5] : memref<256x256xbf16, #tpu.memory_space<vmem>>, vector<256x256xbf16>
    %cst = arith.constant dense<0.000000e+00> : vector<16x256xf32>
    %6 = tpu.matmul %4, %5, %cst {dimension_numbers = #tpu.dot_dimension_numbers<[1], [0], [0], [1], [0, 0, 1, 1], [], []>} : vector<16x256xbf16>, vector<256x256xbf16>, vector<16x256xf32> -> vector<16x256xf32>
    %7 = arith.addf %3, %6 : vector<16x256xf32>
    %c0_6 = arith.constant 0 : index
    %c0_7 = arith.constant 0 : index
    %8 = vector.load %arg6[%c0_6, %c0_7] : memref<16x256xf32, #tpu.memory_space<vmem>>, vector<16x256xf32>
    tpu.vector_store %arg6[%c0_6, %c0_7], %7 {strides = array<i32>} : memref<16x256xf32, #tpu.memory_space<vmem>>, vector<16x256xf32>,
    %9 = tpu.iteration_bound 1 : i32
    %c1_i32 = arith.constant 1 : i32
    %10 = arith.subi %9, %c1_i32 : i32
    %11 = arith.cmpi eq, %arg1, %10 : i32
    %12 = arith.extui %11 : i1 to i32
    %c0_i32_8 = arith.constant 0 : i32
    %13 = arith.cmpi ne, %12, %c0_i32_8 : i32
    scf.if %13 {
      %c0_9 = arith.constant 0 : index
      %c0_10 = arith.constant 0 : index
      %14 = vector.load %arg6[%c0_9, %c0_10] : memref<16x256xf32, #tpu.memory_space<vmem>>, vector<16x256xf32>
      %c0_11 = arith.constant 0 : index
      %c0_12 = arith.constant 0 : index
      %15 = vector.load %arg4[%c0_11, %c0_12] : memref<1x256xf32, #tpu.memory_space<vmem>>, vector<1x256xf32>
      %16 = vector.broadcast %15 : vector<1x256xf32> to vector<16x256xf32>
      %17 = arith.addf %14, %16 : vector<16x256xf32>
      %c0_13 = arith.constant 0 : index
      %c0_14 = arith.constant 0 : index
      %18 = vector.load %arg5[%c0_13, %c0_14] : memref<16x256xf32, #tpu.memory_space<vmem>>, vector<16x256xf32>
      tpu.vector_store %arg5[%c0_13, %c0_14], %17 {strides = array<i32>} : memref<16x256xf32, #tpu.memory_space<vmem>>, vector<16x256xf32>,
    } else {
    }
    return
  }
  func.func @transform_0(%arg0: i32, %arg1: i32) -> (i32, i32) {
    %c0_i32 = arith.constant 0 : i32
    return %arg0, %arg1 : i32, i32
  }
  func.func @transform_1(%arg0: i32, %arg1: i32) -> (i32, i32) {
    %c0_i32 = arith.constant 0 : i32
    %c0_i32_0 = arith.constant 0 : i32
    return %arg1, %c0_i32 : i32, i32
  }
  func.func @transform_2(%arg0: i32, %arg1: i32) -> (i32, i32) {
    %c0_i32 = arith.constant 0 : i32
    %c0_i32_0 = arith.constant 0 : i32
    %c0_i32_1 = arith.constant 0 : i32
    return %c0_i32, %c0_i32_0 : i32, i32
  }
  func.func @transform_3(%arg0: i32, %arg1: i32) -> (i32, i32) {
    %c0_i32 = arith.constant 0 : i32
    %c0_i32_0 = arith.constant 0 : i32
    return %arg0, %c0_i32 : i32, i32
  }
}

</mosaic_0001>

<bundles_post_ra>
// kernel: tpu_custom_call.1
= control target key start
LH: loop header
LB: loop body
LE: loop exit
PB: predicated region body
PF: predicated region fallthrough
CT: control target
= control target key end

     0   :  { %s1445_s0 = inlined_call_operand.<no memory space> [shape: s32[], index: 0, kind: input, shape index: {}]   ;;  %s1446_s1 = inlined_call_operand.hbm [shape: bf16[16,256], index: 1, kind: input, shape index: {}]   ;;  %s1447_s2 = inlined_call_operand.hbm [shape: bf16[256,256], index: 2, kind: input, shape index: {}]   ;;  %s1448_s3 = inlined_call_operand.hbm [shape: f32[1,256], index: 3, kind: input, shape index: {}]   ;;  %s1449_s4 = inlined_call_operand.hbm [shape: f32[16,256], index: 4, kind: output, shape index: {}]  }
   0x1   :  { %1452 = sst [smem:[#allocation15_spill]] %s1446_s1 }
   0x2   :  { %1453 = sst [smem:[#allocation16_spill]] %s1448_s3 }
   0x3   :  { %9 = vsyncpa [#allocation4], 0 }
   0x4   :  { %11 = vsyncpa [#allocation4 + $0x1], 0 }
   0x5   :  { %12 = vsyncpa [#allocation7], 0 }
   0x6   :  { %14 = vsyncpa [#allocation7 + $0x1], 0 }
   0x7   :  { %15 = vsyncpa [#allocation5], 0  ;;  %s1450_s17 = sadd.s32 2, %s1445_s0 }
   0x8   :  { %p692_p0 = scmp.le.s32.totalorder %s1450_s17, 0 }
   0xa   :  { %661 = sbr.rel (%p692_p0) target bundleno = 301 (0x12d), region = 89 }
   0xf   :  { %s1193_s20 = smov 0   ;;  %s1195_s21 = smov 0  }
  0x10   :  { %s1197_s22 = smov 0   ;;  %s1199_s23 = smov 0  }
  0x11   :  { %s1201_s24 = smov 0   ;;  %s1203_s25 = smov 0  }
  0x12 LB: > { %s1222_s26 = sadd.s32 4294967295, %s1152_s25   ;;  %s43_s27 = sadd.s32 1, %s1140_s22  ;;  %s1152_s25 = sphi %s1203_s25, %s20_s25   ;;  %s1148_s24 = sphi %s1201_s24, %s1469_s24   ;;  %s1144_s23 = sphi %s1199_s23, %s1468_s23   ;;  %s1140_s22 = sphi %s1197_s22, %s1467_s22   ;;  %s1136_s21 = sphi %s1195_s21, %s1466_s21   ;;  %s1132_s20 = sphi %s1193_s20, %s1465_s20  }
  0x13   : > { %p51_p1 = scmp.ne.s32.totalorder %s1140_s22, %s1136_s21  ;;  %p52_p2 = scmp.eq.s32.totalorder %s1152_s25, 0 }
  0x14   : > { %p58_p3 = scmp.ne.s32.totalorder %s1136_s21, %s1132_s20  ;;  %p59_p4 = scmp.eq.s32.totalorder %s1222_s26, 0 }
  0x15   : > { %p1230_p5 = por %p52_p2, %p51_p1  ;;  %p695_p7 = scmp.ge.s32.totalorder %s1152_s25, 1 }
  0x16   : > { %p1239_p6 = por %p59_p4, %p58_p3  ;;  %s152_s9 = sadd.s32 1, %s1445_s0 }
  0x17   : > { %p153_p8 = scmp.lt.s32.totalorder %s1152_s25, %s152_s9  ;;  %s1456_s3 = sld [smem:[#allocation16_spill]] }
  0x18   : > { %s1154_s14 = smov [#allocation8]   ;;  %p913_p11 = scmp.lt.s32.totalorder %s1152_s25, %s1445_s0 }
  0x19   : > { %p1251_p9 = pnand %p695_p7, %p153_p8  ;;  %s167_s15 = sshll.u32 %s1154_s14, 4  ;;  %s168_s15 = int_to_ptr.vmem [resolvable:$true] %s167_s15 }
  0x1a   : > { %s1262_s19 = sand.u32 1, %s1140_s22   ;;  %p1268_p13 = pnand %p913_p11, %p1230_p5 }
  0x1b   : > { %p901_p10 = pneg %p1251_p9  ;;  %s31_s29 = sadd.s32 1, %s1148_s24 }
  0x1c   : > { %s698_s30 = sshll.u32 %s1262_s19, 4  ;;  %p32_p0 = scmp.ge.s32.totalorder %s31_s29, %s1445_s0 }
  0x1d   : > { %s165_s12 = sshll.u32 %s1456_s3, 4  ;;  %p902_p12 = pnand %p901_p10, %p59_p4  ;;  %s166_s12 = int_to_ptr.hbm [resolvable:$true] %s165_s12 }
  0x1e   : > { %s852_s9 = sshll.u32 %s1148_s24, 3  ;;  %s182_s10 = scalar_lea.vmem [#allocation3], %s698_s30 }
  0x1f   : > { %904 = dma.hbm_to_vmem [thread:$0]  (!%p902_p12), %s166_s12, 32, %s168_s15, [#allocation7]  }
  0x20   : > { %s193_s11 = sshll.u32 %s182_s10, 4  ;;  %s1471_s29 = smov (%p32_p0, %s31_s29), 0  ;;  %s194_s11 = int_to_ptr.vmem [resolvable:$true] %s193_s11 }
  0x21   : > { %1459 = sst [smem:[#allocation14_spill]] %s1471_s29  ;;  %s39_s12 = ssub.s32 %s1148_s24, %s1471_s29 }
  0x22   : > { %s1460_s1 = sld [smem:[#allocation15_spill]]  ;;  %p41_p1 = scmp.eq.s32.totalorder %s39_s12, 0 }
  0x23   : > { %s179_s7 = scalar_lea.sflag [#allocation4], %s1262_s19  ;;  %p1006_p3 = pneg %p1268_p13 }
  0x24   : > { %s1288_s18 = scalar_select %p41_p1, %s1140_s22, %s43_s27  }
  0x28   : > { %s190_s16 = scalar_lea.hbm %s1460_s1, %s852_s9  ;;  %s1009_s28 = scalar_lea.hbm %s1460_s1, 16 }
  0x29   : > { %s191_s15 = sshll.u32 %s190_s16, 4  ;;  %s192_s15 = int_to_ptr.hbm [resolvable:$true] %s191_s15 }
  0x2a   : > { %s1002_s8 = sshra.s32 %s192_s15, 4  ;;  %s1003_s8 = int_to_ptr.hbm [resolvable:$true] %s1002_s8 }
  0x2b   : > { %s1004_s30 = scalar_lea.hbm %s1003_s8, 16  ;;  %p1010_p8 = scmp.lt.s32.totalorder %s1003_s8, %s1460_s1 }
  0x2c   : > { %p1005_p2 = scmp.ne.s32.totalorder %s1003_s8, %s1004_s30  ;;  %p1011_p10 = scmp.lt.s32.totalorder %s1009_s28, %s1004_s30 }
  0x2e   : > { %p1007_p5 = pnand %p1006_p3, %p1005_p2  ;;  %p1012_p11 = por %p1011_p10, %p1010_p8 }
  0x30   : > { %p1008_p7 = pneg %p1007_p5 }
  0x32   : > { %p1013_p12 = pnand %p1012_p11, %p1008_p7 }
  0x34   : > { %1016 = shalt.err (!%p1013_p12)
}
  0x35   : > { %s1155_s27 = smov 128   ;;  %s1156_s12 = smov 8  }
  0x36   : > { %908 = dma.hbm_to_vmem [thread:$0]  (!%p1268_p13), %s192_s15, 256, %s194_s11, %s179_s7, %s1155_s27, %s1155_s27, %s1156_s12  }
  0x37   : > { %s203_s17 = sand.u32 1, %s1152_s25   ;;  %s701_s9 = sshll.u32 %s1262_s19, 8 }
  0x38   : > { %s854_s10 = sshll.u32 %s1148_s24, 8  ;;  %s207_s5 = scalar_lea.vmem [#allocation6], %s701_s9 }
  0x39   : > { %s216_s3 = sshll.u32 %s207_s5, 4  ;;  %s213_s30 = scalar_lea.hbm %s1447_s2, %s854_s10  ;;  %s217_s3 = int_to_ptr.vmem [resolvable:$true] %s216_s3 }
  0x3a   : > { %s214_s28 = sshll.u32 %s213_s30, 4  ;;  %s204_s16 = scalar_lea.sflag [#allocation7], %s203_s17  ;;  %s215_s28 = int_to_ptr.hbm [resolvable:$true] %s214_s28 }
  0x3b   : > { %s1032_s1 = sshra.s32 %s215_s28, 4  ;;  %s1039_s5 = scalar_lea.hbm %s1447_s2, 256  ;;  %s1033_s1 = int_to_ptr.hbm [resolvable:$true] %s1032_s1 }
  0x3c   : > { %s1034_s29 = scalar_lea.hbm %s1033_s1, 256  ;;  %p1040_p5 = scmp.lt.s32.totalorder %s1033_s1, %s1447_s2 }
  0x3d   : > { %p1035_p0 = scmp.ne.s32.totalorder %s1033_s1, %s1034_s29  ;;  %p1041_p7 = scmp.lt.s32.totalorder %s1039_s5, %s1034_s29 }
  0x3f   : > { %p1037_p1 = pnand %p1035_p0, %p1006_p3  ;;  %p1042_p8 = por %p1041_p7, %p1040_p5 }
  0x41   : > { %p1038_p2 = pneg %p1037_p1 }
  0x43   : > { %p1043_p10 = pnand %p1042_p8, %p1038_p2 }
  0x45   : > { %1046 = shalt.err (!%p1043_p10)
}
  0x46   : > { %911 = dma.hbm_to_vmem [thread:$0]  (!%p1268_p13), %s215_s28, 4096, %s217_s3, %s204_s16, %s1155_s27, %s1155_s27, %s1156_s12  }
  0x47   : > { %229 = sbr.rel (%p1251_p9) target bundleno = 292 (0x124), region = 32  ;;  %s231_s17 = sand.u32 (!%p1251_p9), 1, %s1136_s21  }
  0x48   : > { %s706_s9 = sshll.u32 (!%p1251_p9), %s231_s17, 4  ;;  %s232_s10 = scalar_lea.sflag (!%p1251_p9), [#allocation4], %s231_s17 }
  0x49   : > { %s1324_s14 = scalar_lea.vmem (!%p1251_p9), [#allocation3], %s706_s9 }
  0x4c   : > { %1115 = dma.done.wait (%p1239_p6), %s232_s10, 256  }
  0x4d   : > { %1117 = vsyncadd (%p1239_p6), %s232_s10, 4294967040  ;;  %s241_s1 = sand.u32 1, %s1222_s26   ;;  %s707_s20 = sshll.u32 %s231_s17, 8 }
  0x4e   : > { %s242_s3 = scalar_lea.sflag [#allocation7], %s241_s1  ;;  %s1331_s29 = scalar_lea.vmem [#allocation6], %s707_s20 }
  0x4f   : > { %1119 = dma.done.wait (%p1239_p6), %s242_s3, 4096  }
  0x50   : > { %1121 = vsyncadd (%p1239_p6), %s242_s3, 4294963200 }
  0x51   : > { %1123 = dma.done.wait (%p59_p4), [#allocation7], 32  }
  0x52   : > { %1125 = vsyncadd (%p59_p4), [#allocation7], 4294967264  ;;  %p709_p9 = scmp.ne.s32.totalorder %s1144_s23, 0 }
  0x54   : > { %281 = sbr.rel (%p709_p9) target bundleno = 94 (0x5e), region = 48 }
  0x59   : > { %v1157_v0 = vmov 0.0  }
  0x5a   : > { %282 = vst [vmem:[#allocation2 + $0x10] sm:$0xff] %v1157_v0 }
  0x5b   : > { %283 = vst [vmem:[#allocation2] sm:$0xff] %v1157_v0 }
  0x5c   : > { %284 = vst [vmem:[#allocation2 + $0x18] sm:$0xff] %v1157_v0 }
  0x5d   : > { %285 = vst [vmem:[#allocation2 + $0x8] sm:$0xff] %v1157_v0 }
  0x5e PF: > { %v776_v1 = vld [vmem:[%s1331_s29 + $0x70] sm:$0xf]  ;;  %v872_v2 = vld [vmem:[%s1331_s29 + $0x74] sm:$0xf0]  ;;  %v871_v6 = vld [vmem:[%s1331_s29 + $0x74] sm:$0xf] }
  0x5f   : > { %v840_v3 = vld [vmem:[%s1331_s29 + $0xf0] sm:$0xf]  ;;  %v777_v4 = vor.u32 %v872_v2, %v776_v1  ;;  %v888_v5 = vld [vmem:[%s1331_s29 + $0xf4] sm:$0xf0]  ;;  %v778_v7 = vld [vmem:[%s1331_s29 + $0x78] sm:$0xf0] }
  0x60   : > { %v841_v8 = vor.u32 %v888_v5, %v840_v3  ;;  %v781_v9 = vor.u32 %v871_v6, %v778_v7  ;;  %v887_v10 = vld [vmem:[%s1331_s29 + $0xf4] sm:$0xf]  ;;  %v842_v11 = vld [vmem:[%s1331_s29 + $0xf8] sm:$0xf0]  ;;  %v768_v12 = vld [vmem:[%s1331_s29 + $0x60] sm:$0xf] }
  0x61   : > { %494 = vmatpush.bf16.msra.mxu0 %v777_v4  ;;  %v845_v13 = vor.u32 %v887_v10, %v842_v11  ;;  %v870_v14 = vld [vmem:[%s1331_s29 + $0x64] sm:$0xf0]  ;;  %v832_v15 = vld [vmem:[%s1331_s29 + $0xe0] sm:$0xf]  ;;  %v869_v19 = vld [vmem:[%s1331_s29 + $0x64] sm:$0xf] }
  0x62   : > { %v886_v16 = vld [vmem:[%s1331_s29 + $0xe4] sm:$0xf0]  ;;  %508 = vmatpush.bf16.msra.mxu1 %v841_v8  ;;  %522 = vmatpush.bf16.msra.mxu2 %v781_v9  ;;  %v769_v17 = vor.u32 %v870_v14, %v768_v12  ;;  %v770_v20 = vld [vmem:[%s1331_s29 + $0x68] sm:$0xf0]  ;;  %v885_v21 = vld [vmem:[%s1331_s29 + $0xe4] sm:$0xf] }
  0x63   : > { %v833_v18 = vor.u32 %v886_v16, %v832_v15  ;;  %536 = vmatpush.bf16.msra.mxu3 %v845_v13  ;;  %v773_v22 = vor.u32 %v869_v19, %v770_v20  ;;  %v834_v23 = vld [vmem:[%s1331_s29 + $0xe8] sm:$0xf0]  ;;  %v760_v24 = vld [vmem:[%s1331_s29 + $0x50] sm:$0xf]  ;;  %v868_v25 = vld [vmem:[%s1331_s29 + $0x54] sm:$0xf0] }
  0x64   : > { %v837_v26 = vor.u32 %v885_v21, %v834_v23  ;;  %v824_v27 = vld [vmem:[%s1331_s29 + $0xd0] sm:$0xf]  ;;  %v884_v28 = vld [vmem:[%s1331_s29 + $0xd4] sm:$0xf0]  ;;  %v867_v29 = vld [vmem:[%s1331_s29 + $0x54] sm:$0xf]  ;;  %v761_v30 = vor.u32 %v868_v25, %v760_v24 }
  0x65   : > { %495 = vmatpush.bf16.msra.mxu0 %v769_v17  ;;  %v762_v31 = vld [vmem:[%s1331_s29 + $0x58] sm:$0xf0]  ;;  %v883_v32 = vld [vmem:[%s1331_s29 + $0xd4] sm:$0xf]  ;;  %v825_v34 = vor.u32 %v884_v28, %v824_v27  ;;  %v752_v36 = vld [vmem:[%s1331_s29 + $0x40] sm:$0xf] }
  0x66   : > { %v826_v33 = vld [vmem:[%s1331_s29 + $0xd8] sm:$0xf0]  ;;  %509 = vmatpush.bf16.msra.mxu1 %v833_v18  ;;  %523 = vmatpush.bf16.msra.mxu2 %v773_v22  ;;  %v765_v35 = vor.u32 %v867_v29, %v762_v31  ;;  %v866_v37 = vld [vmem:[%s1331_s29 + $0x44] sm:$0xf0]  ;;  %v816_v38 = vld [vmem:[%s1331_s29 + $0xc0] sm:$0xf] }
  0x67   : > { %537 = vmatpush.bf16.msra.mxu3 %v837_v26  ;;  %v829_v39 = vor.u32 %v883_v32, %v826_v33  ;;  %v882_v40 = vld [vmem:[%s1331_s29 + $0xc4] sm:$0xf0]  ;;  %v865_v41 = vld [vmem:[%s1331_s29 + $0x44] sm:$0xf]  ;;  %v754_v42 = vld [vmem:[%s1331_s29 + $0x48] sm:$0xf0]  ;;  %v753_v45 = vor.u32 %v866_v37, %v752_v36 }
  0x68   : > { %v881_v43 = vld [vmem:[%s1331_s29 + $0xc4] sm:$0xf]  ;;  %v818_v44 = vld [vmem:[%s1331_s29 + $0xc8] sm:$0xf0]  ;;  %v817_v46 = vor.u32 %v882_v40, %v816_v38  ;;  %v757_v47 = vor.u32 %v865_v41, %v754_v42  ;;  %v744_v48 = vld [vmem:[%s1331_s29 + $0x30] sm:$0xf] }
  0x69   : > { %496 = vmatpush.bf16.msra.mxu0 %v761_v30  ;;  %v864_v49 = vld [vmem:[%s1331_s29 + $0x34] sm:$0xf0]  ;;  %v808_v50 = vld [vmem:[%s1331_s29 + $0xb0] sm:$0xf]  ;;  %v821_v51 = vor.u32 %v881_v43, %v818_v44  ;;  %v863_v53 = vld [vmem:[%s1331_s29 + $0x34] sm:$0xf] }
  0x6a   : > { %510 = vmatpush.bf16.msra.mxu1 %v825_v34  ;;  %524 = vmatpush.bf16.msra.mxu2 %v765_v35  ;;  %v880_v52 = vld [vmem:[%s1331_s29 + $0xb4] sm:$0xf0]  ;;  %v746_v54 = vld [vmem:[%s1331_s29 + $0x38] sm:$0xf0]  ;;  %v879_v55 = vld [vmem:[%s1331_s29 + $0xb4] sm:$0xf]  ;;  %v745_v57 = vor.u32 %v864_v49, %v744_v48 }
  0x6b   : > { %538 = vmatpush.bf16.msra.mxu3 %v829_v39  ;;  %v810_v56 = vld [vmem:[%s1331_s29 + $0xb8] sm:$0xf0]  ;;  %v809_v58 = vor.u32 %v880_v52, %v808_v50  ;;  %v749_v59 = vor.u32 %v863_v53, %v746_v54  ;;  %v736_v60 = vld [vmem:[%s1331_s29 + $0x20] sm:$0xf]  ;;  %v862_v61 = vld [vmem:[%s1331_s29 + $0x24] sm:$0xf0] }
  0x6c   : > { %v800_v62 = vld [vmem:[%s1331_s29 + $0xa0] sm:$0xf]  ;;  %v813_v63 = vor.u32 %v879_v55, %v810_v56  ;;  %v878_v0 = vld [vmem:[%s1331_s29 + $0xa4] sm:$0xf0]  ;;  %v861_v1 = vld [vmem:[%s1331_s29 + $0x24] sm:$0xf]  ;;  %v737_v5 = vor.u32 %v862_v61, %v736_v60 }
  0x6d   : > { %497 = vmatpush.bf16.msra.mxu0 %v753_v45  ;;  %v738_v2 = vld [vmem:[%s1331_s29 + $0x28] sm:$0xf0]  ;;  %v877_v3 = vld [vmem:[%s1331_s29 + $0xa4] sm:$0xf]  ;;  %v801_v6 = vor.u32 %v878_v0, %v800_v62  ;;  %v728_v8 = vld [vmem:[%s1331_s29 + $0x10] sm:$0xf] }
  0x6e   : > { %511 = vmatpush.bf16.msra.mxu1 %v817_v46  ;;  %525 = vmatpush.bf16.msra.mxu2 %v757_v47  ;;  %v802_v4 = vld [vmem:[%s1331_s29 + $0xa8] sm:$0xf0]  ;;  %v741_v7 = vor.u32 %v861_v1, %v738_v2  ;;  %v860_v9 = vld [vmem:[%s1331_s29 + $0x14] sm:$0xf0]  ;;  %v792_v10 = vld [vmem:[%s1331_s29 + $0x90] sm:$0xf] }
  0x6f   : > { %539 = vmatpush.bf16.msra.mxu3 %v821_v51  ;;  %v805_v11 = vor.u32 %v877_v3, %v802_v4  ;;  %v876_v12 = vld [vmem:[%s1331_s29 + $0x94] sm:$0xf0]  ;;  %v859_v13 = vld [vmem:[%s1331_s29 + $0x14] sm:$0xf]  ;;  %v730_v14 = vld [vmem:[%s1331_s29 + $0x18] sm:$0xf0]  ;;  %v729_v17 = vor.u32 %v860_v9, %v728_v8 }
  0x70   : > { %v875_v15 = vld [vmem:[%s1331_s29 + $0x94] sm:$0xf]  ;;  %v794_v16 = vld [vmem:[%s1331_s29 + $0x98] sm:$0xf0]  ;;  %v793_v18 = vor.u32 %v876_v12, %v792_v10  ;;  %v733_v19 = vor.u32 %v859_v13, %v730_v14  ;;  %v720_v20 = vld [vmem:[%s1331_s29] sm:$0xf] }
  0x71   : > { %498 = vmatpush.bf16.msra.mxu0 %v745_v57  ;;  %v858_v21 = vld [vmem:[%s1331_s29 + $0x4] sm:$0xf0]  ;;  %v784_v22 = vld [vmem:[%s1331_s29 + $0x80] sm:$0xf]  ;;  %v797_v23 = vor.u32 %v875_v15, %v794_v16  ;;  %v857_v25 = vld [vmem:[%s1331_s29 + $0x4] sm:$0xf] }
  0x72   : > { %512 = vmatpush.bf16.msra.mxu1 %v809_v58  ;;  %526 = vmatpush.bf16.msra.mxu2 %v749_v59  ;;  %v874_v24 = vld [vmem:[%s1331_s29 + $0x84] sm:$0xf0]  ;;  %v722_v26 = vld [vmem:[%s1331_s29 + $0x8] sm:$0xf0]  ;;  %v873_v27 = vld [vmem:[%s1331_s29 + $0x84] sm:$0xf]  ;;  %v721_v29 = vor.u32 %v858_v21, %v720_v20 }
  0x73   : > { %540 = vmatpush.bf16.msra.mxu3 %v813_v63  ;;  %v786_v28 = vld [vmem:[%s1331_s29 + $0x88] sm:$0xf0]  ;;  %v712_v30 = vld [vmem:[%s1324_s14] sm:$0xf]  ;;  %v856_v31 = vld [vmem:[%s1324_s14 + $0x4] sm:$0xf0]  ;;  %v785_v32 = vor.u32 %v874_v24, %v784_v22  ;;  %v725_v33 = vor.u32 %v857_v25, %v722_v26 }
  0x74   : > { %v855_v34 = vld [vmem:[%s1324_s14 + $0x4] sm:$0xf]  ;;  %v714_v35 = vld [vmem:[%s1324_s14 + $0x8] sm:$0xf0]  ;;  %v789_v36 = vor.u32 %v873_v27, %v786_v28  ;;  %v713_v37 = vor.u32 %v856_v31, %v712_v30  ;;  %s1461_s27 = sadd.s32 4294967295, %s1445_s0 }
  0x75   : > { %499 = vmatpush.bf16.msra.mxu0 %v737_v5  ;;  %v717_v38 = vor.u32 %v855_v34, %v714_v35  ;;  %v286_v40 = vld [vmem:[#allocation2 + $0x10] sm:$0xff]  ;;  %v287_v45 = vld [vmem:[#allocation2] sm:$0xff]  ;;  %v288_v49 = vld [vmem:[#allocation2 + $0x18] sm:$0xff]  ;;  %p847_p4 = scmp.ne.s32.totalorder %s1144_s23, %s1461_s27 }
  0x76   : > { %513 = vmatpush.bf16.msra.mxu1 %v801_v6  ;;  %527 = vmatpush.bf16.msra.mxu2 %v741_v7  ;;  %v289_v55 = vld [vmem:[#allocation2 + $0x8] sm:$0xff] }
  0x77   : > { %541 = vmatpush.bf16.msra.mxu3 %v805_v11 }
  0x79   : > { %500 = vmatpush.bf16.msra.mxu0 %v729_v17 }
  0x7a   : > { %514 = vmatpush.bf16.msra.mxu1 %v793_v18  ;;  %528 = vmatpush.bf16.msra.mxu2 %v733_v19 }
  0x7b   : > { %542 = vmatpush.bf16.msra.mxu3 %v797_v23 }
  0x7d   : > { %501 = vmatpush.bf16.msra.mxu0 %v721_v29 }
  0x7e   : > { %515 = vmatpush.bf16.msra.mxu1 %v785_v32  ;;  %529 = vmatpush.bf16.msra.mxu2 %v725_v33 }
  0x7f   : > { %543 = vmatpush.bf16.msra.mxu3 %v789_v36 }
  0x80   : > { %502 = vmatmul.bf16.vlgmr.msra.gmra.mxu0 %v713_v37 }
  0x81   : > { %516 = vmatmul.bf16.vlgmr.msra.gmra.mxu1 %v717_v38  ;;  %530 = vmatmul.bf16.vlgmr.msra.gmra.mxu2 %v713_v37 }
  0x82   : > { %544 = vmatmul.bf16.vlgmr.msra.gmra.mxu3 %v717_v38 }
  0xfd   : > { %v503_v39 = vpop.f32.mrf.mxu0 }
  0xfe   : > { %v517_v41 = vpop.f32.mrf.mxu1 }
  0xff   : > { %v518_v42 = vadd.f32 %v517_v41, %v503_v39 }
 0x101   : > { %v550_v43 = vadd.f32 %v518_v42, %v286_v40 }
 0x103   : > { %554 = vst [vmem:[#allocation2 + $0x10] sm:$0xff] %v550_v43 }
 0x104   : > { %v531_v44 = vpop.f32.mrf.mxu2 }
 0x105   : > { %v545_v46 = vpop.f32.mrf.mxu3  ;;  %v505_v47 = vpop.f32.mrf.mxu0 }
 0x106   : > { %v546_v48 = vadd.f32 %v545_v46, %v531_v44  ;;  %v519_v50 = vpop.f32.mrf.mxu1 }
 0x107   : > { %v520_v51 = vadd.f32 %v519_v50, %v505_v47 }
 0x108   : > { %v551_v52 = vadd.f32 %v546_v48, %v287_v45 }
 0x109   : > { %v552_v53 = vadd.f32 %v520_v51, %v288_v49 }
 0x10a   : > { %555 = vst [vmem:[#allocation2] sm:$0xff] %v551_v52 }
 0x10b   : > { %556 = vst [vmem:[#allocation2 + $0x18] sm:$0xff] %v552_v53 }
 0x10c   : > { %v533_v54 = vpop.f32.mrf.mxu2 }
 0x10d   : > { %v547_v56 = vpop.f32.mrf.mxu3 }
 0x10e   : > { %v548_v57 = vadd.f32 %v547_v56, %v533_v54  ;;  %562 = sbr.rel (%p847_p4) target bundleno = 285 (0x11d), region = 52 }
 0x110   : > { %v553_v58 = vadd.f32 %v548_v57, %v289_v55 }
 0x112   : > { %557 = vst [vmem:[#allocation2 + $0x8] sm:$0xff] %v553_v58 }
 0x113   : > { %v563_v59 = vld [vmem:[#allocation2 + $0x10] sm:$0xff]  ;;  %v567_v60 = vld [vmem:[#allocation8] sm:$0x3]  ;;  %v565_v0 = vld [vmem:[#allocation2 + $0x18] sm:$0xff] }
 0x114   : > { %v564_v61 = vld [vmem:[#allocation2] sm:$0xff]  ;;  %v569_v62 = vperm.slane %v567_v60, 0  ;;  %v570_v63 = vperm.slane %v567_v60, 1 }
 0x116   : > { %v573_v2 = vadd.f32 %v569_v62, %v563_v59  ;;  %v574_v3 = vadd.f32 %v570_v63, %v564_v61  ;;  %v575_v4 = vadd.f32 %v569_v62, %v565_v0 }
 0x118   : > { %577 = vst [vmem:[#allocation9] sm:$0xff] %v573_v2 }
 0x119   : > { %v566_v1 = vld [vmem:[#allocation2 + $0x8] sm:$0xff]  ;;  %578 = vst [vmem:[#allocation9 + $0x8] sm:$0xff] %v574_v3 }
 0x11a   : > { %v576_v5 = vadd.f32 %v570_v63, %v566_v1  ;;  %579 = vst [vmem:[#allocation9 + $0x10] sm:$0xff] %v575_v4 }
 0x11c   : > { %580 = vst [vmem:[#allocation9 + $0x18] sm:$0xff] %v576_v5 }
 0x11d PF: > { %s1462_s23 = sadd.s32 4294967295, %s1445_s0  ;;  %s592_s16 = sshll.u32 %s1449_s4, 4  ;;  %s593_s16 = int_to_ptr.hbm [resolvable:$true] %s592_s16 }
 0x11e   : > { %p915_p6 = scmp.eq.s32.totalorder %s1222_s26, %s1462_s23  ;;  %s1158_s19 = smov [#allocation9]  }
 0x11f   : > { %s590_s11 = sshll.u32 %s1158_s19, 4  ;;  %s1159_s5 = smov 256   ;;  %s591_s11 = int_to_ptr.vmem [resolvable:$true] %s590_s11 }
 0x120   : > { %s1160_s15 = smov 16  }
 0x121   : > { %898 = dma.vmem_to_hbm [thread:$0]  (%p915_p6), %s591_s11, 512, %s593_s16, [#allocation5], %s1159_s5, %s1159_s5, %s1160_s15  }
 0x122   : > { %1127 = dma.done.wait (%p915_p6), [#allocation5], 512  }
 0x123   : > { %1129 = vsyncadd (%p915_p6), [#allocation5], 4294966784 }
 0x124 PF: > { %s20_s25 = sadd.s32 1, %s1152_s25   ;;  %s1463_s26 = sadd.s32 2, %s1445_s0 }
 0x125   : > { %s1464_s9 = sld [smem:[#allocation14_spill]]  ;;  %p19_p13 = scmp.ge.s32.totalorder %s20_s25, %s1463_s26 }
 0x126   : > { %s1465_s20 = smov %s1136_s21  ;;  %s1466_s21 = smov %s1140_s22 }
 0x127   : > { %s1467_s22 = smov %s1288_s18  ;;  %s1468_s23 = smov %s1148_s24 }
 0x128   :  { %22 = sbr.rel (!%p19_p13) target bundleno = 18 (0x12), region = 95 }
 0x12b   : > { %s1469_s24 = smov %s1464_s9 }
 0x12d PF:  { %609 = vsyncpa [#allocation4], 1 }
 0x12e   :  { %611 = vsyncpa [#allocation4 + $0x1], 1 }
 0x12f   :  { %612 = vsyncpa [#allocation7], 1 }
 0x130   :  { %614 = vsyncpa [#allocation7 + $0x1], 1 }
 0x131   :  { %615 = vsyncpa [#allocation5], 1 }
 0x132   :  { %617 = vsyncpa [#allocation5 + $0x1], 1 }

</bundles_post_ra>
